<compile_context>
chip_gen: v6e
topology: v6e:2x2x1
jax: 0.10.0
libtpu: 0.0.40
codegen_flags: <defaults>
</compile_context>

<pallas_src>
import functools

import jax
import jax.numpy as jnp
from jax.experimental import pallas as pl
from jax.experimental.pallas import tpu as pltpu


# ---------------------------------------------------------------------------
# Fused multi-layer RGCN kernel (grid over subgraphs, 2 matmuls per layer)
# ---------------------------------------------------------------------------
def _rgcn_fused_kernel(x_ref, adj_ref, w_ref, b_ref, o_ref, *,
                       num_layers, num_rel_blocks, n, dout, din_pad):
    """One grid step = one subgraph.

      x_ref   (N, Din_pad)               f32  zero-padded input features
      adj_ref (N, (R+1)*N)               f32  lane-dense adjacency, identity
                                              appended as the last N-block
      w_ref   (L, Din_pad, (R+1)*Dout)   f32  packed weights, W_self last block
      b_ref   (L, 1, Dout)               f32  biases
      o_ref   (N, Dout)                  f32  output node features
    """
    h = x_ref[...]            # (N, Din_pad)  f32, stays in registers
    a = adj_ref[...]          # (N, RB*N)     f32

    for l in range(num_layers):
        # Per-relation feature transform + self-loop: ONE lane-dense matmul
        # (N, Din_pad) @ (Din_pad, (R+1)*Dout) -> (N, (R+1)*Dout), f32 regs.
        xw = jnp.dot(h, w_ref[l], preferred_element_type=jnp.float32)

        # Restack lane blocks into row blocks: row r*N + s holds h[s] @ W_r.
        xw_stack = jnp.concatenate(
            [xw[:, r * dout:(r + 1) * dout] for r in range(num_rel_blocks)],
            axis=0)                                          # ((R+1)*N, Dout)

        # Message aggregation + self-loop + bias: ONE matmul
        # (N, (R+1)*N) @ ((R+1)*N, Dout) -> (N, Dout), f32 accumulation.
        acc = jnp.dot(a, xw_stack, preferred_element_type=jnp.float32) + b_ref[l]

        # Activation = ReLU; dropout is identity in eval mode.
        h = jnp.maximum(acc, 0.0)

        # If a hidden layer is narrower than Din_pad, re-pad (not hit when
        # hidden_dim >= init_emb + pos_emb, as in this model config).
        if l + 1 < num_layers and dout < din_pad:
            h = jnp.concatenate(
                [h, jnp.zeros((n, din_pad - dout), h.dtype)], axis=-1)

    o_ref[...] = h.astype(o_ref.dtype)


# ---------------------------------------------------------------------------
# One-time weight packing (hoisted out of the per-call path)
# ---------------------------------------------------------------------------
def pack_rgcn_weights(params):
    """Precompute packed kernel weight operands once at model load."""
    layers = params["layers"]
    num_layers = len(layers)
    num_rels = layers[0]["w_comp"].shape[0]
    dout = layers[0]["w_self"].shape[1]
    rb = num_rels + 1            # +1 relation block for the folded self-loop

    w_alls, dins = [], []
    for layer in layers:
        # basis decomposition  W_r = sum_b w_comp[r, b] * basis_b
        w_rel = jnp.einsum("rb,bio->rio", layer["w_comp"], layer["bases"])
        din = w_rel.shape[1]
        # lane-dense packing W_all[:, r*Dout:(r+1)*Dout] = W_r ; self-loop last
        w_all = jnp.concatenate(
            [jnp.transpose(w_rel, (1, 0, 2)).reshape(din, num_rels * dout),
             layer["w_self"]], axis=1)                    # (Din, (R+1)*Dout)
        w_alls.append(w_all)
        dins.append(din)

    din_pad = max(dins)
    w_slab = jnp.zeros((num_layers, din_pad, rb * dout), jnp.float32)
    for l, (w_all, din) in enumerate(zip(w_alls, dins)):
        w_slab = w_slab.at[l, :din, :].set(w_all.astype(jnp.float32))
    biases = jnp.stack([layer["bias"] for layer in layers], axis=0)  # (L,1,Dout)

    return {"w_slab": w_slab, "biases": biases.astype(jnp.float32),
            "din0": dins[0], "din_pad": din_pad,
            "num_rels": num_rels, "dout": dout}


# ---------------------------------------------------------------------------
# Batched forward (this is the jitted per-call path: just the pallas_call)
# ---------------------------------------------------------------------------
def rgcn_forward_batched(w_slab, biases, x0, adj_cat):
    """Fused RGCN forward over a batch of subgraphs.

    w_slab:  (L, Din_pad, (R+1)*Dout) f32
    biases:  (L, 1, Dout)             f32
    x0:      (B, N, Din_pad)          f32  zero-padded concat(embed, pos_feat)
    adj_cat: (B, N, (R+1)*N)          f32  adj[r,dst,src] blocks + identity
    returns: (B, N, Dout)             f32  (g.ndata['h'] per subgraph)
    """
    num_layers, din_pad, wcols = w_slab.shape
    dout = biases.shape[-1]
    rb = wcols // dout
    bsz, n, _ = x0.shape

    kernel = functools.partial(
        _rgcn_fused_kernel, num_layers=num_layers, num_rel_blocks=rb,
        n=n, dout=dout, din_pad=din_pad)

    return pl.pallas_call(
        kernel,
        out_shape=jax.ShapeDtypeStruct((bsz, n, dout), jnp.float32),
        grid_spec=pltpu.PrefetchScalarGridSpec(
            num_scalar_prefetch=0,
            grid=(bsz,),
            in_specs=[
                # per-subgraph operands: batch dim squeezed, rest full-extent
                pl.BlockSpec((None, n, din_pad), lambda b: (b, 0, 0)),
                pl.BlockSpec((None, n, rb * n), lambda b: (b, 0, 0)),
                # weights: constant index_map -> DMA'd once, resident in VMEM
                pl.BlockSpec((num_layers, din_pad, rb * dout),
                             lambda b: (0, 0, 0)),
                pl.BlockSpec((num_layers, 1, dout), lambda b: (0, 0, 0)),
            ],
            out_specs=pl.BlockSpec((None, n, dout), lambda b: (b, 0, 0)),
        ),
        compiler_params=pltpu.CompilerParams(
            dimension_semantics=("parallel",)),
    )(x0, adj_cat, w_slab, biases)


# ---------------------------------------------------------------------------
# Pure-JAX reference (f32, HIGHEST precision) for correctness checking
# ---------------------------------------------------------------------------
def rgcn_reference(params, pos_feat, adj):
    hp = jax.lax.Precision.HIGHEST
    x = jnp.concatenate([params["embed"], pos_feat], axis=-1).astype(jnp.float32)
    adj_f = adj.astype(jnp.float32)
    for layer in params["layers"]:
        w_rel = jnp.einsum("rb,bio->rio", layer["w_comp"], layer["bases"],
                           precision=hp)
        msg = jnp.einsum("rds,sj,rjo->do", adj_f, x, w_rel, precision=hp)
        x = jnp.maximum(jnp.dot(x, layer["w_self"], precision=hp)
                        + msg + layer["bias"], 0.0)
    return x


# ---------------------------------------------------------------------------
# Parameter / model setup (glue, plain JAX)
# ---------------------------------------------------------------------------
def xavier_uniform(key, shape, gain=1.0):
    fan_in, fan_out = shape[-2], shape[-1]
    limit = gain * jnp.sqrt(6.0 / (fan_in + fan_out))
    return jax.random.uniform(key, shape, jnp.float32, -limit, limit)


def init_rgcn_params(key, *, num_nodes, init_emb, pos_emb, hid_emb,
                     aug_num_rels, num_bases, num_layers):
    relu_gain = jnp.sqrt(2.0)
    keys = jax.random.split(key, 2 + 4 * num_layers)
    params = {
        "embed": xavier_uniform(keys[0], (num_nodes, init_emb), gain=relu_gain),
        "layers": [],
    }
    in_dim = init_emb + pos_emb
    k_idx = 1
    for layer_idx in range(num_layers):
        din = in_dim if layer_idx == 0 else hid_emb
        dout = hid_emb
        bases = xavier_uniform(keys[k_idx], (num_bases, din, dout), gain=relu_gain)
        w_comp = xavier_uniform(keys[k_idx + 1], (aug_num_rels, num_bases),
                                gain=relu_gain)
        w_self = xavier_uniform(keys[k_idx + 2], (din, dout), gain=relu_gain)
        bias = jnp.zeros((1, dout), jnp.float32)
        params["layers"].append(
            {"bases": bases, "w_comp": w_comp, "w_self": w_self, "bias": bias})
        k_idx += 4
    return params


# ---------------------------------------------------------------------------
# Main
# ---------------------------------------------------------------------------
if __name__ == "__main__":
    # small, module-consistent shapes
    NUM_NODES = 16       # params.num_nodes (subgraph size)
    INIT_EMB = 8         # params.init_emb_dim
    POS_EMB = 8          # params.inp_dim (positional label features)
    HID_EMB = 32         # params.hidden_dim
    AUG_NUM_RELS = 4     # params.aug_num_rels
    NUM_BASES = 2        # params.num_bases
    NUM_LAYERS = 2       # params.num_gcn_layers
    BATCH = 4            # number of subgraphs batched into one kernel launch
    NUM_EDGES = 48

    key = jax.random.PRNGKey(0)
    k_param, k_pos, k_src, k_dst, k_rel = jax.random.split(key, 5)

    params = init_rgcn_params(
        k_param,
        num_nodes=NUM_NODES, init_emb=INIT_EMB, pos_emb=POS_EMB,
        hid_emb=HID_EMB, aug_num_rels=AUG_NUM_RELS, num_bases=NUM_BASES,
        num_layers=NUM_LAYERS)

    # deterministic synthetic batch of subgraphs: positional feats + typed edges
    pos_feat = jax.random.normal(k_pos, (BATCH, NUM_NODES, POS_EMB), jnp.float32)
    src = jax.random.randint(k_src, (BATCH, NUM_EDGES), 0, NUM_NODES)
    dst = jax.random.randint(k_dst, (BATCH, NUM_EDGES), 0, NUM_NODES)
    rel = jax.random.randint(k_rel, (BATCH, NUM_EDGES), 0, AUG_NUM_RELS)

    # dense per-relation adjacency: adj[b, r, dst, src] = #edges
    adj = jnp.zeros((BATCH, AUG_NUM_RELS, NUM_NODES, NUM_NODES), jnp.float32)
    b_idx = jnp.arange(BATCH)[:, None]
    adj = adj.at[b_idx, rel, dst, src].add(1.0)

    # --- one-time weight packing (NOT in the per-call path) ---
    packed = pack_rgcn_weights(params)
    din0, din_pad = packed["din0"], packed["din_pad"]

    # per-call graph-dependent operands (glue, plain JAX)
    x0 = jnp.concatenate(
        [jnp.broadcast_to(params["embed"], (BATCH, NUM_NODES, INIT_EMB)),
         pos_feat], axis=-1)                                   # (B, N, Din0)
    x0 = jnp.pad(x0, ((0, 0), (0, 0), (0, din_pad - din0)))     # (B, N, Din_pad)

    eye = jnp.broadcast_to(jnp.eye(NUM_NODES, dtype=jnp.float32),
                           (BATCH, NUM_NODES, NUM_NODES))
    adj_cat = jnp.concatenate(
        [jnp.transpose(adj, (0, 2, 1, 3)).reshape(
            BATCH, NUM_NODES, AUG_NUM_RELS * NUM_NODES),
         eye], axis=-1)                                        # (B, N, (R+1)*N)

    fwd = jax.jit(rgcn_forward_batched)
    h = jax.block_until_ready(
        fwd(packed["w_slab"], packed["biases"], x0, adj_cat))

    # correctness vs pure-JAX f32 reference (per subgraph)
    h_ref = jax.jit(jax.vmap(lambda pf, a: rgcn_reference(params, pf, a)))(
        pos_feat, adj)
    h_ref = jax.block_until_ready(h_ref)

    assert h.shape == (BATCH, NUM_NODES, HID_EMB)
    assert bool(jnp.all(jnp.isfinite(h)))
    rel_err = jnp.max(jnp.abs(h - h_ref)) / (jnp.max(jnp.abs(h_ref)) + 1e-6)
    assert rel_err < 1e-2, f"kernel/reference mismatch: rel_err={rel_err}"
    print("KERNEL_OK")
</pallas_src>

<mosaic_0001>
module attributes {stable_mosaic.version = 11 : i64} {
  func.func @_rgcn_fused_kernel(%arg0: i32, %arg1: memref<1x16x32xf32, #tpu.memory_space<vmem>>, %arg2: memref<1x16x80xf32, #tpu.memory_space<vmem>>, %arg3: memref<2x32x160xf32, #tpu.memory_space<vmem>>, %arg4: memref<2x1x32xf32, #tpu.memory_space<vmem>>, %arg5: memref<1x16x32xf32, #tpu.memory_space<vmem>>) attributes {dimension_semantics = [#tpu.dimension_semantics<parallel>], iteration_bounds = array<i64: 4>, scalar_prefetch = 0 : i64, scratch_operands = 0 : i64, tpu.core_type = #tpu.core_type<tc>, window_params = [{transform_indices = @transform_0, window_bounds = array<i64: 1, 16, 32>}, {transform_indices = @transform_1, window_bounds = array<i64: 1, 16, 80>}, {pipeline_mode = #tpu.pipeline_mode<synchronous>, transform_indices = @transform_2, window_bounds = array<i64: 2, 32, 160>}, {pipeline_mode = #tpu.pipeline_mode<synchronous>, transform_indices = @transform_3, window_bounds = array<i64: 2, 1, 32>}, {transform_indices = @transform_4, window_bounds = array<i64: 1, 16, 32>}]} {
    %c0 = arith.constant 0 : index
    %c0_0 = arith.constant 0 : index
    %c0_1 = arith.constant 0 : index
    %0 = vector.load %arg1[%c0, %c0_0, %c0_1] : memref<1x16x32xf32, #tpu.memory_space<vmem>>, vector<1x16x32xf32>
    %1 = vector.shape_cast %0 : vector<1x16x32xf32> to vector<16x32xf32>
    %c0_2 = arith.constant 0 : index
    %c0_3 = arith.constant 0 : index
    %c0_4 = arith.constant 0 : index
    %2 = vector.load %arg2[%c0_2, %c0_3, %c0_4] : memref<1x16x80xf32, #tpu.memory_space<vmem>>, vector<1x16x80xf32>
    %3 = vector.shape_cast %2 : vector<1x16x80xf32> to vector<16x80xf32>
    %c0_5 = arith.constant 0 : index
    %c0_6 = arith.constant 0 : index
    %c0_7 = arith.constant 0 : index
    %4 = vector.load %arg3[%c0_5, %c0_6, %c0_7] : memref<2x32x160xf32, #tpu.memory_space<vmem>>, vector<1x32x160xf32>
    %5 = vector.shape_cast %4 : vector<1x32x160xf32> to vector<32x160xf32>
    %cst = arith.constant dense<0.000000e+00> : vector<16x160xf32>
    %6 = tpu.matmul %1, %5, %cst {dimension_numbers = #tpu.dot_dimension_numbers<[1], [0], [0], [1], [0, 0, 1, 1], [], []>} : vector<16x32xf32>, vector<32x160xf32>, vector<16x160xf32> -> vector<16x160xf32>
    %7 = vector.extract_strided_slice %6 {offsets = [0, 0], sizes = [16, 32], strides = [1, 1]} : vector<16x160xf32> to vector<16x32xf32>
    %8 = vector.extract_strided_slice %6 {offsets = [0, 32], sizes = [16, 32], strides = [1, 1]} : vector<16x160xf32> to vector<16x32xf32>
    %9 = vector.extract_strided_slice %6 {offsets = [0, 64], sizes = [16, 32], strides = [1, 1]} : vector<16x160xf32> to vector<16x32xf32>
    %10 = vector.extract_strided_slice %6 {offsets = [0, 96], sizes = [16, 32], strides = [1, 1]} : vector<16x160xf32> to vector<16x32xf32>
    %11 = vector.extract_strided_slice %6 {offsets = [0, 128], sizes = [16, 32], strides = [1, 1]} : vector<16x160xf32> to vector<16x32xf32>
    %12 = tpu.concatenate %7, %8, %9, %10, %11 in 0 : vector<16x32xf32>, vector<16x32xf32>, vector<16x32xf32>, vector<16x32xf32>, vector<16x32xf32> -> vector<80x32xf32>
    %cst_8 = arith.constant dense<0.000000e+00> : vector<16x32xf32>
    %13 = tpu.matmul %3, %12, %cst_8 {dimension_numbers = #tpu.dot_dimension_numbers<[1], [0], [0], [1], [0, 0, 1, 1], [], []>} : vector<16x80xf32>, vector<80x32xf32>, vector<16x32xf32> -> vector<16x32xf32>
    %c0_9 = arith.constant 0 : index
    %c0_10 = arith.constant 0 : index
    %c0_11 = arith.constant 0 : index
    %14 = vector.load %arg4[%c0_9, %c0_10, %c0_11] : memref<2x1x32xf32, #tpu.memory_space<vmem>>, vector<1x1x32xf32>
    %15 = vector.shape_cast %14 : vector<1x1x32xf32> to vector<1x32xf32>
    %16 = vector.broadcast %15 : vector<1x32xf32> to vector<16x32xf32>
    %17 = arith.addf %13, %16 : vector<16x32xf32>
    %cst_12 = arith.constant 0.000000e+00 : f32
    %18 = vector.broadcast %cst_12 : f32 to vector<16x32xf32>
    %19 = arith.maximumf %17, %18 : vector<16x32xf32>
    %c1 = arith.constant 1 : index
    %c0_13 = arith.constant 0 : index
    %c0_14 = arith.constant 0 : index
    %20 = vector.load %arg3[%c1, %c0_13, %c0_14] : memref<2x32x160xf32, #tpu.memory_space<vmem>>, vector<1x32x160xf32>
    %21 = vector.shape_cast %20 : vector<1x32x160xf32> to vector<32x160xf32>
    %cst_15 = arith.constant dense<0.000000e+00> : vector<16x160xf32>
    %22 = tpu.matmul %19, %21, %cst_15 {dimension_numbers = #tpu.dot_dimension_numbers<[1], [0], [0], [1], [0, 0, 1, 1], [], []>} : vector<16x32xf32>, vector<32x160xf32>, vector<16x160xf32> -> vector<16x160xf32>
    %23 = vector.extract_strided_slice %22 {offsets = [0, 0], sizes = [16, 32], strides = [1, 1]} : vector<16x160xf32> to vector<16x32xf32>
    %24 = vector.extract_strided_slice %22 {offsets = [0, 32], sizes = [16, 32], strides = [1, 1]} : vector<16x160xf32> to vector<16x32xf32>
    %25 = vector.extract_strided_slice %22 {offsets = [0, 64], sizes = [16, 32], strides = [1, 1]} : vector<16x160xf32> to vector<16x32xf32>
    %26 = vector.extract_strided_slice %22 {offsets = [0, 96], sizes = [16, 32], strides = [1, 1]} : vector<16x160xf32> to vector<16x32xf32>
    %27 = vector.extract_strided_slice %22 {offsets = [0, 128], sizes = [16, 32], strides = [1, 1]} : vector<16x160xf32> to vector<16x32xf32>
    %28 = tpu.concatenate %23, %24, %25, %26, %27 in 0 : vector<16x32xf32>, vector<16x32xf32>, vector<16x32xf32>, vector<16x32xf32>, vector<16x32xf32> -> vector<80x32xf32>
    %cst_16 = arith.constant dense<0.000000e+00> : vector<16x32xf32>
    %29 = tpu.matmul %3, %28, %cst_16 {dimension_numbers = #tpu.dot_dimension_numbers<[1], [0], [0], [1], [0, 0, 1, 1], [], []>} : vector<16x80xf32>, vector<80x32xf32>, vector<16x32xf32> -> vector<16x32xf32>
    %c1_17 = arith.constant 1 : index
    %c0_18 = arith.constant 0 : index
    %c0_19 = arith.constant 0 : index
    %30 = vector.load %arg4[%c1_17, %c0_18, %c0_19] : memref<2x1x32xf32, #tpu.memory_space<vmem>>, vector<1x1x32xf32>
    %31 = vector.shape_cast %30 : vector<1x1x32xf32> to vector<1x32xf32>
    %32 = vector.broadcast %31 : vector<1x32xf32> to vector<16x32xf32>
    %33 = arith.addf %29, %32 : vector<16x32xf32>
    %cst_20 = arith.constant 0.000000e+00 : f32
    %34 = vector.broadcast %cst_20 : f32 to vector<16x32xf32>
    %35 = arith.maximumf %33, %34 : vector<16x32xf32>
    %c0_21 = arith.constant 0 : index
    %c0_22 = arith.constant 0 : index
    %c0_23 = arith.constant 0 : index
    %36 = vector.load %arg5[%c0_21, %c0_22, %c0_23] : memref<1x16x32xf32, #tpu.memory_space<vmem>>, vector<1x16x32xf32>
    %37 = vector.shape_cast %36 : vector<1x16x32xf32> to vector<16x32xf32>
    %38 = vector.shape_cast %35 : vector<16x32xf32> to vector<1x16x32xf32>
    tpu.vector_store %arg5[%c0_21, %c0_22, %c0_23], %38 {strides = array<i32>} : memref<1x16x32xf32, #tpu.memory_space<vmem>>, vector<1x16x32xf32>,
    return
  }
  func.func @transform_0(%arg0: i32) -> (i32, i32, i32) {
    %c0_i32 = arith.constant 0 : i32
    %c0_i32_0 = arith.constant 0 : i32
    %c0_i32_1 = arith.constant 0 : i32
    return %arg0, %c0_i32, %c0_i32_0 : i32, i32, i32
  }
  func.func @transform_1(%arg0: i32) -> (i32, i32, i32) {
    %c0_i32 = arith.constant 0 : i32
    %c0_i32_0 = arith.constant 0 : i32
    %c0_i32_1 = arith.constant 0 : i32
    return %arg0, %c0_i32, %c0_i32_0 : i32, i32, i32
  }
  func.func @transform_2(%arg0: i32) -> (i32, i32, i32) {
    %c0_i32 = arith.constant 0 : i32
    %c0_i32_0 = arith.constant 0 : i32
    %c0_i32_1 = arith.constant 0 : i32
    %c0_i32_2 = arith.constant 0 : i32
    return %c0_i32, %c0_i32_0, %c0_i32_1 : i32, i32, i32
  }
  func.func @transform_3(%arg0: i32) -> (i32, i32, i32) {
    %c0_i32 = arith.constant 0 : i32
    %c0_i32_0 = arith.constant 0 : i32
    %c0_i32_1 = arith.constant 0 : i32
    %c0_i32_2 = arith.constant 0 : i32
    return %c0_i32, %c0_i32_0, %c0_i32_1 : i32, i32, i32
  }
  func.func @transform_4(%arg0: i32) -> (i32, i32, i32) {
    %c0_i32 = arith.constant 0 : i32
    %c0_i32_0 = arith.constant 0 : i32
    %c0_i32_1 = arith.constant 0 : i32
    return %arg0, %c0_i32, %c0_i32_0 : i32, i32, i32
  }
}

</mosaic_0001>

<bundles_post_ra>
// kernel: rgcn_forward_batched.1
= control target key start
LH: loop header
LB: loop body
LE: loop exit
PB: predicated region body
PF: predicated region fallthrough
CT: control target
= control target key end

     0   :  { %s1523_s0 = inlined_call_operand.hbm [shape: f32[4,16,32], index: 0, kind: input, shape index: {}]   ;;  %s1524_s1 = inlined_call_operand.hbm [shape: f32[4,16,80], index: 1, kind: input, shape index: {}]   ;;  %s1525_s2 = inlined_call_operand.hbm [shape: f32[2,32,160], index: 2, kind: input, shape index: {}]   ;;  %s1526_s3 = inlined_call_operand.hbm [shape: f32[2,1,32], index: 3, kind: input, shape index: {}]   ;;  %s1527_s4 = inlined_call_operand.hbm [shape: f32[4,16,32], index: 4, kind: output, shape index: {}]  }
   0x1   :  { %1531 = sst [smem:[#allocation16_spill]] %s1523_s0 }
   0x2   :  { %9 = vsyncpa [#allocation3], 0 }
   0x3   :  { %11 = vsyncpa [#allocation3 + $0x1], 0 }
   0x4   :  { %12 = vsyncpa [#allocation6], 0 }
   0x5   :  { %14 = vsyncpa [#allocation6 + $0x1], 0 }
   0x6   :  { %15 = vsyncpa [#allocation9], 0 }
   0x7   :  { %16 = vsyncpa [#allocation4], 0 }
   0x8   :  { %18 = vsyncpa [#allocation4 + $0x1], 0  ;;  %s1235_s15 = smov 0   ;;  %s1237_s16 = smov 0  }
   0x9   :  { %s1239_s17 = smov 0   ;;  %s1241_s18 = smov 0  }
   0xa LB: > { %s1256_s19 = sadd.s32 4294967295, %s1192_s18   ;;  %s820_s20 = sadd.s32 4294967294, %s1192_s18   ;;  %s1192_s18 = sphi %s1241_s18, %s1550_s18   ;;  %s1188_s17 = sphi %s1239_s17, %s1549_s17   ;;  %s1184_s16 = sphi %s1237_s16, %s1548_s16   ;;  %s1180_s15 = sphi %s1235_s15, %s1547_s15  }
   0xb   : > { %p44_p0 = scmp.ne.s32.totalorder %s1184_s16, %s1180_s15  ;;  %p1528_p1 = scmp.eq.s32.totalorder %s1256_s19, 0 }
   0xc   : > { %p142_p3 = scmp.eq.s32.totalorder %s820_s20, 3  ;;  %p821_p5 = scmp.ge.s32.totalorder %s1192_s18, 1 }
   0xd   : > { %p1265_p4 = por %p1528_p1, %p44_p0  ;;  %p149_p7 = scmp.lt.s32.totalorder %s1192_s18, 5 }
   0xe   : > { %p1270_p6 = por %p142_p3, %p44_p0  ;;  %s1194_s24 = smov [#allocation7]  }
   0xf   : > { %s1532_s21 = scalar_select %p1265_p4, 1, 0 }
  0x10   : > { %s1533_s22 = scalar_select %p1270_p6, 1, 0 }
  0x11   : > { %p1275_p8 = pnand %p821_p5, %p149_p7  ;;  %s161_s25 = sshll.u32 %s1194_s24, 4  ;;  %s162_s25 = int_to_ptr.vmem [resolvable:$true] %s161_s25 }
  0x12   : > { %s1195_s27 = smov [#allocation8]   ;;  %s1019_s29 = scalar_lea.vmem %s162_s25, 2048 }
  0x13   : > { %p939_p9 = pneg %p1275_p8  ;;  %s174_s28 = sshll.u32 %s1195_s27, 4  ;;  %s175_s28 = int_to_ptr.vmem [resolvable:$true] %s174_s28 }
  0x14   : > { %p1020_p12 = scmp.ne.s32.totalorder %s162_s25, %s1019_s29  ;;  %p1027_p3 = scmp.lt.s32.totalorder %s162_s25, %s162_s25 }
  0x15   : > { %p1283_p10 = pnand %p939_p9, %p1528_p1  ;;  %p1028_p5 = scmp.lt.s32.totalorder %s1019_s29, %s1019_s29 }
  0x17   : > { %p1010_p11 = pneg %p1283_p10  ;;  %p1029_p7 = por %p1028_p5, %p1027_p3 }
  0x19   : > { %p1022_p13 = pnand %p1020_p12, %p1010_p11 }
  0x1b   : > { %p1023_p0 = pneg %p1022_p13 }
  0x1d   : > { %p1030_p9 = pnand %p1029_p7, %p1023_p0 }
  0x1f   : > { %1033 = shalt.err (!%p1030_p9)
}
  0x20   : > { %s1196_s30 = smov 256   ;;  %s1197_s5 = smov 16  }
  0x21   : > { %942 = dma.hbm_to_vmem [thread:$0]  (!%p1283_p10), %s1525_s2, 2048, %s162_s25, [#allocation6], %s1196_s30, %s1196_s30, %s1197_s5  }
  0x22   : > { %s1045_s8 = scalar_lea.vmem %s175_s28, 32  ;;  %p1053_p2 = scmp.lt.s32.totalorder %s175_s28, %s175_s28 }
  0x23   : > { %p1046_p1 = scmp.ne.s32.totalorder %s175_s28, %s1045_s8  ;;  %p1054_p6 = scmp.lt.s32.totalorder %s1045_s8, %s1045_s8 }
  0x25   : > { %p1048_p12 = pnand %p1046_p1, %p1010_p11  ;;  %p1055_p3 = por %p1054_p6, %p1053_p2 }
  0x27   : > { %p1049_p13 = pneg %p1048_p12 }
  0x29   : > { %p1056_p0 = pnand %p1055_p3, %p1049_p13 }
  0x2b   : > { %1059 = shalt.err (!%p1056_p0)
}
  0x2c   : > { %s1198_s9 = smov 1   ;;  %s1306_s12 = sadd.s32 1, %s1192_s18  }
  0x2d   : > { %945 = dma.hbm_to_vmem [thread:$0]  (!%p1283_p10), %s1526_s3, 32, %s175_s28, [#allocation9], %s1197_s5, %s1197_s5, %s1198_s9  }
  0x2e   : > { %s28_s13 = ssub.s32 %s1192_s18, %s1306_s12  ;;  %s31_s14 = sadd.s32 1, %s1188_s17 }
  0x2f   : > { %p29_p1 = scmp.eq.s32.totalorder %s28_s13, 0  ;;  %p38_p2 = scmp.ne.s32.totalorder %s1188_s17, %s1184_s16 }
  0x30   : > { %p39_p6 = scmp.eq.s32.totalorder %s1192_s18, 0  ;;  %p959_p11 = scmp.lt.s32.totalorder %s1192_s18, 4 }
  0x31   : > { %s1316_s20 = scalar_select %p29_p1, %s1188_s17, %s31_s14  }
  0x32   : > { %p40_p5 = por %p39_p6, %p38_p2  ;;  %p1536_p7 = scmp.eq.s32.totalorder %s1256_s19, 3 }
  0x33   : > { %s188_s25 = sand.u32 1, %s1188_s17   ;;  %s852_s26 = sshll.u32 %s1192_s18, 8 }
  0x34   : > { %p1320_p9 = por %p1536_p7, %p38_p2  ;;  %s1326_s27 = sshll.u32 %s188_s25, 4 }
  0x35   : > { %s1538_s0 = sld [smem:[#allocation16_spill]]  ;;  %s192_s5 = scalar_lea.vmem [#allocation2], %s1326_s27 }
  0x36   : > { %s1537_s24 = scalar_select %p1320_p9, 1, 0 }
  0x37   : > { %s199_s6 = sshll.u32 %s192_s5, 4  ;;  %p1336_p10 = pnand %p959_p11, %p40_p5  ;;  %s1340_s6 = int_to_ptr.vmem [resolvable:$true] %s199_s6 }
  0x38   : > { %s1342_s8 = scalar_lea.sflag [#allocation3], %s188_s25 }
  0x39   : > { %p1062_p13 = pneg %p1336_p10 }
  0x3b   : > { %s1333_s30 = scalar_lea.hbm %s1538_s0, %s852_s26  ;;  %s1065_s13 = scalar_lea.hbm %s1538_s0, 1024 }
  0x3c   : > { %s1060_s9 = scalar_lea.hbm %s1333_s30, 256  ;;  %p1066_p1 = scmp.lt.s32.totalorder %s1333_s30, %s1538_s0 }
  0x3d   : > { %p1061_p12 = scmp.ne.s32.totalorder %s1333_s30, %s1060_s9  ;;  %p1067_p2 = scmp.lt.s32.totalorder %s1065_s13, %s1060_s9 }
  0x3f   : > { %p1063_p3 = pnand %p1062_p13, %p1061_p12  ;;  %p1068_p6 = por %p1067_p2, %p1066_p1 }
  0x41   : > { %p1064_p0 = pneg %p1063_p3 }
  0x43   : > { %p1069_p11 = pnand %p1068_p6, %p1064_p0 }
  0x45   : > { %1072 = shalt.err (!%p1069_p11)
}
  0x46   : > { %s1073_s25 = scalar_lea.vmem %s1340_s6, 256  ;;  %s1199_s29 = smov [#allocation2]  }
  0x47   : > { %p1074_p5 = scmp.ne.s32.totalorder %s1340_s6, %s1073_s25  ;;  %s1078_s5 = sshll.u32 %s1199_s29, 4  ;;  %s1079_s5 = int_to_ptr.vmem [resolvable:$false] %s1078_s5 }
  0x48   : > { %s1080_s10 = scalar_lea.vmem %s1079_s5, 512  ;;  %p1081_p3 = scmp.lt.s32.totalorder %s1340_s6, %s1079_s5 }
  0x49   : > { %p1076_p7 = pnand %p1074_p5, %p1062_p13  ;;  %p1082_p9 = scmp.lt.s32.totalorder %s1080_s10, %s1073_s25 }
  0x4b   : > { %p1077_p12 = pneg %p1076_p7  ;;  %p1083_p4 = por %p1082_p9, %p1081_p3 }
  0x4d   : > { %p1084_p1 = pnand %p1083_p4, %p1077_p12 }
  0x4f   : > { %1087 = shalt.err (!%p1084_p1)
}
  0x50   : > { %s1200_s9 = smov 128   ;;  %s1201_s11 = smov 8  }
  0x51   : > { %949 = dma.hbm_to_vmem [thread:$0]  (!%p1336_p10), %s1333_s30, 256, %s1340_s6, %s1342_s8, %s1200_s9, %s1200_s9, %s1201_s11  }
  0x52   : > { %s1377_s28 = scalar_lea.hbm %s1524_s1, %s852_s26  ;;  %s213_s25 = scalar_lea.vmem [#allocation5], %s1326_s27 }
  0x53   : > { %s220_s29 = sshll.u32 %s213_s25, 4  ;;  %s209_s5 = sand.u32 1, %s1192_s18   ;;  %s1381_s29 = int_to_ptr.vmem [resolvable:$true] %s220_s29 }
  0x54   : > { %s210_s10 = scalar_lea.sflag [#allocation6], %s209_s5  ;;  %s1088_s0 = scalar_lea.hbm %s1377_s28, 256 }
  0x55   : > { %p1089_p4 = scmp.ne.s32.totalorder %s1377_s28, %s1088_s0  ;;  %s1093_s26 = scalar_lea.hbm %s1524_s1, 1024 }
  0x56   : > { %p1094_p2 = scmp.lt.s32.totalorder %s1377_s28, %s1524_s1  ;;  %p1095_p6 = scmp.lt.s32.totalorder %s1093_s26, %s1088_s0 }
  0x57   : > { %p1091_p9 = pnand %p1089_p4, %p1062_p13 }
  0x58   : > { %p1096_p11 = por %p1095_p6, %p1094_p2 }
  0x59   : > { %p1092_p0 = pneg %p1091_p9 }
  0x5b   : > { %p1097_p5 = pnand %p1096_p11, %p1092_p0 }
  0x5d   : > { %1100 = shalt.err (!%p1097_p5)
}
  0x5e   : > { %s1101_s27 = scalar_lea.vmem %s1381_s29, 256  ;;  %s1202_s14 = smov [#allocation5]  }
  0x5f   : > { %p1102_p7 = scmp.ne.s32.totalorder %s1381_s29, %s1101_s27  ;;  %s1106_s25 = sshll.u32 %s1202_s14, 4  ;;  %s1107_s25 = int_to_ptr.vmem [resolvable:$false] %s1106_s25 }
  0x60   : > { %s1108_s5 = scalar_lea.vmem %s1107_s25, 512  ;;  %p1109_p1 = scmp.lt.s32.totalorder %s1381_s29, %s1107_s25 }
  0x61   : > { %p1104_p12 = pnand %p1102_p7, %p1062_p13  ;;  %p1110_p4 = scmp.lt.s32.totalorder %s1108_s5, %s1101_s27 }
  0x63   : > { %p1105_p3 = pneg %p1104_p12  ;;  %p1111_p9 = por %p1110_p4, %p1109_p1 }
  0x65   : > { %p1112_p2 = pnand %p1111_p9, %p1105_p3 }
  0x67   : > { %1115 = shalt.err (!%p1112_p2)
}
  0x68   : > { %952 = dma.hbm_to_vmem [thread:$0]  (!%p1336_p10), %s1377_s28, 256, %s1381_s29, %s210_s10, %s1200_s9, %s1200_s9, %s1201_s11  }
  0x69   : > { %232 = sbr.rel (%p1275_p8) target bundleno = 1200 (0x4b0), region = 36  ;;  %s1411_s0 = sand.u32 (!%p1275_p8), 1, %s1184_s16  }
  0x6a   : > { %s1414_s30 = sshll.u32 (!%p1275_p8), %s1411_s0, 4  ;;  %s235_s6 = scalar_lea.sflag (!%p1275_p8), [#allocation3], %s1411_s0 }
  0x6b   : > { %s238_s7 = scalar_lea.vmem (!%p1275_p8), [#allocation2], %s1414_s30  ;;  %p1540_p13 = scmp.ne.s32.totalorder (!%p1275_p8), %s1532_s21, 0 }
  0x6e   : > { %1159 = dma.done.wait (%p1540_p13), %s235_s6, 256  }
  0x6f   : > { %1161 = vsyncadd (%p1540_p13), %s235_s6, 4294967040  ;;  %s243_s23 = sand.u32 1, %s1256_s19   ;;  %s247_s11 = scalar_lea.vmem [#allocation5], %s1414_s30 }
  0x70   : > { %s244_s9 = scalar_lea.sflag [#allocation6], %s243_s23 }
  0x71   : > { %1163 = dma.done.wait (%p1540_p13), %s244_s9, 256  }
  0x72   : > { %1165 = vsyncadd (%p1540_p13), %s244_s9, 4294967040  ;;  %p1541_p8 = scmp.eq.s32.totalorder %s1256_s19, 0 }
  0x74   : > { %1167 = dma.done.wait (%p1541_p8), [#allocation6], 2048   ;;  %p1542_p10 = pmov %p1541_p8 }
  0x75   : > { %p1543_p0 = pmov %p1541_p8 }
  0x76   : > { %1169 = vsyncadd (%p1542_p10), [#allocation6], 4294965248 }
  0x77   : > { %1171 = dma.done.wait (%p1543_p0), [#allocation9], 32   ;;  %p1544_p6 = pmov %p1543_p0 }
  0x78   : > { %v1203_v0 = vmov 0.0   ;;  %v296_v1 = vld [vmem:[#allocation7 + $0x38] sm:$0xff]  ;;  %v295_v2 = vld [vmem:[#allocation7 + $0x30] sm:$0xff]  ;;  %v294_v3 = vld [vmem:[#allocation7 + $0x28] sm:$0xff]  ;;  %vm297_vm0 = vcmask 261120   ;;  %s1204_s21 = smov 64  }
  0x79   : > { %1173 = vsyncadd (%p1544_p6), [#allocation9], 4294967264  ;;  %368 = vmatprep.mubr.f32.mxu1 %v1203_v0  ;;  %571 = vmatprep.mubr.f32.mxu0 %v1203_v0  ;;  %v293_v4 = vld [vmem:[#allocation7 + $0x20] sm:$0xff]  ;;  %v292_v5 = vld [vmem:[#allocation7 + $0x18] sm:$0xff]  ;;  %s1205_s28 = smov 32   ;;  %vm408_vm1 = vcmask 654336  }
  0x7a   : > { %328 = vmatprep.subr.mxu1 %v296_v1  ;;  %v291_v6 = vld [vmem:[#allocation7 + $0x10] sm:$0xff]  ;;  %v290_v7 = vld [vmem:[#allocation7 + $0x8] sm:$0xff]  ;;  %v289_v8 = vld [vmem:[#allocation7] sm:$0xff]  ;;  %s1206_s29 = smov 96   ;;  %s284_s10 = scalar_lea.vmem [#allocation10], %s1414_s30 }
  0x7b   : > { %329 = vmatpush1.msra.mxu1 %v295_v2  ;;  %v285_v9 = vld [vmem:[%s238_s7] sm:$0xff]  ;;  %v286_v10 = vld [vmem:[%s238_s7 + $0x8] sm:$0xff]  ;;  %s705_s26 = sshll.u32 %s284_s10, 4  ;;  %s854_s8 = sshll.u32 %s1256_s19, 8  ;;  %s1479_s26 = int_to_ptr.vmem [resolvable:$true] %s705_s26 }
  0x7c   : > { %330 = vmatprep.subr.mxu1 %v294_v3  ;;  %v287_v15 = vld [vmem:[%s247_s11] sm:$0xff]  ;;  %v500_v16 = vld [vmem:[#allocation7 + $0x78] sm:$0xff]  ;;  %v498_v25 = vld [vmem:[#allocation7 + $0x68] sm:$0xff]  ;;  %s1477_s14 = scalar_lea.hbm %s1527_s4, %s854_s8  ;;  %s692_s25 = scalar_lea.sflag [#allocation4], %s1411_s0 }
  0x7d   : > { %331 = vmatpush1.msra.mxu1 %v293_v4  ;;  %531 = vmatprep.subr.mxu0 %v500_v16  ;;  %v1456_v23 = vld [vmem:[%s247_s11 + $0x8] sm:$0xff]  ;;  %v499_v24 = vld [vmem:[#allocation7 + $0x70] sm:$0xff]  ;;  %v497_v26 = vld [vmem:[#allocation7 + $0x60] sm:$0xff]  ;;  %s1116_s19 = scalar_lea.vmem %s1479_s26, 256  ;;  %p1545_p5 = scmp.ne.s32.totalorder %s1537_s24, 0 }
  0x7e   : > { %332 = vmatprep.subr.mxu1 %v292_v5  ;;  %532 = vmatpush1.msra.mxu0 %v499_v24  ;;  %v496_v27 = vld [vmem:[#allocation7 + $0x58] sm:$0xff]  ;;  %v495_v28 = vld [vmem:[#allocation7 + $0x50] sm:$0xff]  ;;  %v494_v29 = vld [vmem:[#allocation7 + $0x48] sm:$0xff]  ;;  %p1117_p11 = scmp.ne.s32.totalorder %s1479_s26, %s1116_s19  ;;  %s1207_s5 = smov [#allocation10]  }
  0x7f   : > { %333 = vmatpush1.msra.mxu1 %v291_v6  ;;  %533 = vmatprep.subr.mxu0 %v498_v25  ;;  %v493_v30 = vld [vmem:[#allocation7 + $0x40] sm:$0xff]  ;;  %s1120_s30 = sshll.u32 %s1207_s5, 4  ;;  %s1121_s30 = int_to_ptr.vmem [resolvable:$false] %s1120_s30 }
  0x80   : > { %334 = vmatprep.subr.mxu1 %v290_v7  ;;  %534 = vmatpush1.msra.mxu0 %v497_v26  ;;  %v839_v32 = vld [vmem:[#allocation8] ss:$0 sm:$0xff]  ;;  %v844_v48 = vld [vmem:[#allocation8 + $0x1] ss:$0 sm:$0xff]  ;;  %p1118_p7 = pnand %p1117_p11, %p1545_p5  ;;  %s1122_s6 = scalar_lea.vmem %s1121_s30, 512 }
  0x81   : > { %335 = vmatpush1.msra.mxu1 %v289_v8  ;;  %535 = vmatprep.subr.mxu0 %v496_v27  ;;  %p1123_p3 = scmp.lt.s32.totalorder %s1479_s26, %s1121_s30  ;;  %p1124_p1 = scmp.lt.s32.totalorder %s1122_s6, %s1116_s19 }
  0x82   : > { %837 = vmatmul.mubr.msk.f32.vlgmr.msra.gmra.mxu1 %vm297_vm0, %v285_v9  ;;  %536 = vmatpush1.msra.mxu0 %v495_v28  ;;  %p1119_p12 = pneg %p1118_p7 }
  0x83   : > { %374 = vmatprep.mubr.f32.mxu1 %v1203_v0  ;;  %537 = vmatprep.subr.mxu0 %v494_v29  ;;  %p1125_p4 = por %p1124_p1, %p1123_p3 }
  0x84   : > { %538 = vmatpush1.msra.mxu0 %v493_v30 }
  0x85   : > { %p1126_p9 = pnand %p1125_p4, %p1119_p12 }
  0x86   : > { %838 = vmatmul.mubr.msk.f32.gmra.mxu1 %vm297_vm0, %v286_v10 }
  0x87   : > { %899 = vmatprep.mubr.msk.f32.mxu1 %vm408_vm1, %v287_v15 }
 0x142   : > { %v370_v11 = vpop.f32.mrf.mxu1 }
 0x144   : > { %v372_v12 = vpop.f32.mrf.mxu1 }
 0x146   : > { %v376_v13 = vpop.f32.mrf.mxu1 }
 0x147   : > { %391 = vrot.lane.b32.xlu1 %v376_v13, %s1204_s21  ;;  %397 = vrot.lane.b32.xlu0 %v376_v13, %s1205_s28 }
 0x148   : > { %v378_v14 = vpop.f32.mrf.mxu1 }
 0x149   : > { %879 = vmatprep.subr.mxu1 %v378_v14 }
 0x14a   : > { %880 = vmatpush3.msra.mxu1 %v378_v14 }
 0x14b   : > { %389 = vrot.lane.b32.xlu1 %v370_v11, %s1204_s21  ;;  %395 = vrot.lane.b32.xlu0 %v370_v11, %s1205_s28 }
 0x14c   : > { %881 = vmatprep.subr.mxu1 %v372_v12 }
 0x14d   : > { %882 = vmatpush3.msra.mxu1 %v372_v12 }
 0x14f   : > { %383 = vrot.lane.b32.xlu1 %v370_v11, %s1206_s29  ;;  %385 = vrot.lane.b32.xlu0 %v376_v13, %s1206_s29 }
 0x1b9   : > { %v392_v17 = vpop.permute.xlu1 %391  ;;  %v398_v18 = vpop.permute.xlu0 %397 }
 0x1ba   : > { %883 = vmatprep.subr.mxu1 %v398_v18 }
 0x1bb   : > { %884 = vmatpush3.msra.mxu1 %v398_v18 }
 0x1bd   : > { %v396_v19 = vpop.permute.xlu0 %395  ;;  %v390_v20 = vpop.permute.xlu1 %389 }
 0x1be   : > { %885 = vmatprep.subr.mxu1 %v396_v19 }
 0x1bf   : > { %886 = vmatpush3.msra.mxu1 %v396_v19 }
 0x1c0   : > { %887 = vmatprep.subr.mxu1 %v392_v17 }
 0x1c1   : > { %888 = vmatpush3.msra.mxu1 %v392_v17  ;;  %v386_v21 = vpop.permute.xlu0 %385  ;;  %v384_v22 = vpop.permute.xlu1 %383 }
 0x1c2   : > { %889 = vmatprep.subr.mxu1 %v390_v20 }
 0x1c3   : > { %890 = vmatpush3.msra.mxu1 %v390_v20 }
 0x1c4   : > { %891 = vmatprep.subr.mxu1 %v386_v21 }
 0x1c5   : > { %892 = vmatpush3.msra.mxu1 %v386_v21 }
 0x1c6   : > { %893 = vmatprep.subr.mxu1 %v384_v22 }
 0x1c7   : > { %894 = vmatpush3.msra.mxu1 %v384_v22 }
 0x1c8   : > { %895 = vmatprep.subr.mxu1 %v376_v13 }
 0x1c9   : > { %896 = vmatpush3.msra.mxu1 %v376_v13 }
 0x1ca   : > { %897 = vmatprep.subr.mxu1 %v370_v11 }
 0x1cb   : > { %898 = vmatpush3.msra.mxu1 %v370_v11 }
 0x1cc   : > { %900 = vmatmul.mubr.msk.f32.vlgmr.msra.gmra.mxu1 %vm408_vm1, %v1456_v23 }
 0x28c   : > { %v901_v31 = vpop.f32.mrf.mxu1 }
 0x28d   : > { %v487_v35 = vadd.f32 %v901_v31, %v839_v32 }
 0x28e   : > { %v481_v33 = vpop.f32.mrf.mxu1 }
 0x28f   : > { %v482_v34 = vadd.f32 %v839_v32, %v481_v33  ;;  %v491_v37 = vmax.f32 %v487_v35, 0.0 }
 0x291   : > { %v490_v36 = vmax.f32 %v482_v34, 0.0 }
 0x293   : > { %842 = vmatmul.mubr.msk.f32.vlgmr.msra.gmra.mxu0 %vm297_vm0, %v490_v36 }
 0x294   : > { %577 = vmatprep.mubr.f32.mxu0 %v1203_v0 }
 0x297   : > { %843 = vmatmul.mubr.msk.f32.gmra.mxu0 %vm297_vm0, %v491_v37 }
 0x298   : > { %922 = vmatprep.mubr.msk.f32.mxu0 %vm408_vm1, %v287_v15 }
 0x353   : > { %v573_v38 = vpop.f32.mrf.mxu0 }
 0x354   : > { %598 = vrot.lane.b32.xlu1 %v573_v38, %s1205_s28 }
 0x355   : > { %v575_v39 = vpop.f32.mrf.mxu0 }
 0x357   : > { %v579_v40 = vpop.f32.mrf.mxu0 }
 0x358   : > { %592 = vrot.lane.b32.xlu1 %v573_v38, %s1204_s21  ;;  %600 = vrot.lane.b32.xlu0 %v579_v40, %s1205_s28 }
 0x359   : > { %v581_v41 = vpop.f32.mrf.mxu0 }
 0x35a   : > { %902 = vmatprep.subr.mxu0 %v581_v41 }
 0x35b   : > { %903 = vmatpush3.msra.mxu0 %v581_v41 }
 0x35c   : > { %586 = vrot.lane.b32.xlu1 %v573_v38, %s1206_s29  ;;  %594 = vrot.lane.b32.xlu0 %v579_v40, %s1204_s21 }
 0x35d   : > { %904 = vmatprep.subr.mxu0 %v575_v39 }
 0x35e   : > { %905 = vmatpush3.msra.mxu0 %v575_v39 }
 0x360   : > { %588 = vrot.lane.b32.xlu0 %v579_v40, %s1206_s29 }
 0x3c6   : > { %v599_v42 = vpop.permute.xlu1 %598 }
 0x3ca   : > { %v601_v43 = vpop.permute.xlu0 %600  ;;  %v593_v44 = vpop.permute.xlu1 %592 }
 0x3cb   : > { %906 = vmatprep.subr.mxu0 %v601_v43 }
 0x3cc   : > { %907 = vmatpush3.msra.mxu0 %v601_v43 }
 0x3cd   : > { %908 = vmatprep.subr.mxu0 %v599_v42 }
 0x3ce   : > { %v595_v45 = vpop.permute.xlu0 %594  ;;  %909 = vmatpush3.msra.mxu0 %v599_v42  ;;  %v587_v47 = vpop.permute.xlu1 %586 }
 0x3cf   : > { %910 = vmatprep.subr.mxu0 %v595_v45 }
 0x3d0   : > { %911 = vmatpush3.msra.mxu0 %v595_v45 }
 0x3d1   : > { %912 = vmatprep.subr.mxu0 %v593_v44 }
 0x3d2   : > { %v589_v46 = vpop.permute.xlu0 %588  ;;  %913 = vmatpush3.msra.mxu0 %v593_v44 }
 0x3d3   : > { %914 = vmatprep.subr.mxu0 %v589_v46 }
 0x3d4   : > { %915 = vmatpush3.msra.mxu0 %v589_v46 }
 0x3d5   : > { %916 = vmatprep.subr.mxu0 %v587_v47 }
 0x3d6   : > { %917 = vmatpush3.msra.mxu0 %v587_v47 }
 0x3d7   : > { %918 = vmatprep.subr.mxu0 %v579_v40 }
 0x3d8   : > { %919 = vmatpush3.msra.mxu0 %v579_v40 }
 0x3d9   : > { %920 = vmatprep.subr.mxu0 %v573_v38 }
 0x3da   : > { %921 = vmatpush3.msra.mxu0 %v573_v38 }
 0x3db   : > { %923 = vmatmul.mubr.msk.f32.vlgmr.msra.gmra.mxu0 %vm408_vm1, %v1456_v23 }
 0x49b   : > { %v924_v49 = vpop.f32.mrf.mxu0 }
 0x49c   : > { %v684_v50 = vadd.f32 %v924_v49, %v844_v48 }
 0x49d   : > { %v678_v51 = vpop.f32.mrf.mxu0 }
 0x49e   : > { %v688_v52 = vmax.f32 %v684_v50, 0.0  ;;  %v679_v53 = vadd.f32 %v844_v48, %v678_v51 }
 0x4a0   : > { %690 = vst.msk [vmem:[%s284_s10 + $0x8] sm:$0xff] %vm297_vm0, %v688_v52  ;;  %v687_v54 = vmax.f32 %v679_v53, 0.0 }
 0x4a2   : > { %689 = vst.msk [vmem:[%s284_s10] sm:$0xff] %vm297_vm0, %v687_v54 }
 0x4a3   : > { %1129 = shalt.err (!%p1126_p9)
}
 0x4a4   : > { %s1130_s7 = scalar_lea.hbm %s1477_s14, 256  ;;  %s1134_s11 = scalar_lea.hbm %s1527_s4, 1024 }
 0x4a5   : > { %p1131_p2 = scmp.ne.s32.totalorder %s1477_s14, %s1130_s7  ;;  %p1135_p10 = scmp.lt.s32.totalorder %s1477_s14, %s1527_s4 }
 0x4a6   : > { %p1136_p0 = scmp.lt.s32.totalorder %s1134_s11, %s1130_s7 }
 0x4a7   : > { %p1132_p13 = pnand %p1131_p2, %p1545_p5 }
 0x4a8   : > { %p1137_p6 = por %p1136_p0, %p1135_p10 }
 0x4a9   : > { %p1133_p8 = pneg %p1132_p13 }
 0x4ab   : > { %p1138_p11 = pnand %p1137_p6, %p1133_p8 }
 0x4ad   : > { %1141 = shalt.err (!%p1138_p11)
}
 0x4ae   : > { %s1208_s29 = smov 128   ;;  %s1209_s10 = smov 8  }
 0x4af   : > { %937 = dma.vmem_to_hbm [thread:$0]  (%p1545_p5), %s1479_s26, 256, %s1477_s14, %s692_s25, %s1208_s29, %s1208_s29, %s1209_s10  }
 0x4b0 PF: > { %p962_p7 = scmp.ge.s32.totalorder %s1192_s18, 2  ;;  %s720_s8 = sand.u32 1, %s1180_s15  }
 0x4b1   : > { %p1546_p12 = scmp.ne.s32.totalorder %s1533_s22, 0  ;;  %s721_s13 = scalar_lea.sflag [#allocation4], %s720_s8 }
 0x4b3   : > { %p954_p3 = pnand %p962_p7, %p1546_p12 }
 0x4b5   : > { %p955_p1 = pneg %p954_p3 }
 0x4b7   : > { %1175 = dma.done.wait (%p955_p1), %s721_s13, 256  }
 0x4b8   : > { %1177 = vsyncadd (%p955_p1), %s721_s13, 4294967040  ;;  %p21_p4 = scmp.ge.s32.totalorder %s1306_s12, 6   ;;  %s1547_s15 = smov %s1184_s16 }
 0x4b9   : > { %s1548_s16 = smov %s1188_s17  ;;  %s1549_s17 = smov %s1316_s20 }
 0x4ba   : > { %s1550_s18 = smov %s1306_s12  ;;  %23 = sbr.rel (!%p21_p4) target bundleno = 10 (0xa), region = 104 }
 0x4bf   :  { %726 = vsyncpa [#allocation3], 1 }
 0x4c0   :  { %728 = vsyncpa [#allocation3 + $0x1], 1 }
 0x4c1   :  { %729 = vsyncpa [#allocation6], 1 }
 0x4c2   :  { %731 = vsyncpa [#allocation6 + $0x1], 1 }
 0x4c3   :  { %732 = vsyncpa [#allocation9], 1 }
 0x4c4   :  { %733 = vsyncpa [#allocation4], 1 }
 0x4c5   :  { %735 = vsyncpa [#allocation4 + $0x1], 1 }

</bundles_post_ra>
